<compile_context>
chip_gen: v7x
topology: tpu7x:2x2x1
jax: 0.10.0
libtpu: 0.0.40
codegen_flags: <defaults>
</compile_context>

<pallas_src>
import functools

import jax
import jax.numpy as jnp
from jax.experimental import pallas as pl
from jax.experimental.pallas import tpu as pltpu


def _alphamex_kernel(inv_n, n_total, n_tile, chunked, needs_mask,
                     log_r_ref, inv_log_r_ref, x_ref, o_ref, acc_ref):
    """One (bc_tile, n_tile) grid step.

    log_r_ref:     (bc_tile, 1)       precomputed log(alpha/(1-alpha))
    inv_log_r_ref: (bc_tile, 1)       precomputed 1/log_r
    x_ref:         (bc_tile, n_tile)  activations, reduction axis on lanes
    o_ref:         (bc_tile, 1)       output column (resident across N axis)
    acc_ref:       (bc_tile, 128) f32 per-lane-column running sum  (chunked)
                   (bc_tile, 1)   f32 running sum                  (else)
    """
    nk = pl.program_id(1)

    @pl.when(nk == 0)
    def _():
        acc_ref[...] = jnp.zeros_like(acc_ref)

    log_r = log_r_ref[...]                              # (bc_tile, 1)
    xb = x_ref[...].astype(jnp.float32)                 # (bc_tile, n_tile)
    # r ** x == exp(x * log r): exp runs on the EUP; log_r lane-broadcast.
    powed = jnp.exp(xb * log_r)                         # (bc_tile, n_tile)

    if needs_mask:
        # Ragged tail of N: zero out lanes past the true extent.
        lane = jax.lax.broadcasted_iota(jnp.int32, powed.shape, 1)
        col = nk * n_tile + lane
        powed = jnp.where(col < n_total, powed, 0.0)

    if chunked:
        # Plain VPU vreg adds into a lane-dense (bc_tile, 128) partial sum.
        acc = acc_ref[...]
        for j in range(0, n_tile, 128):                 # static, tile-aligned
            acc = acc + powed[:, j:j + 128]
        acc_ref[...] = acc
    else:
        # Single full-extent N block with non-128-multiple width.
        acc_ref[...] += jnp.sum(powed, axis=1, keepdims=True)

    @pl.when(nk == pl.num_programs(1) - 1)
    def _():
        # One cross-lane (XLU) reduce + log epilogue per output tile.
        total = jnp.sum(acc_ref[...], axis=1, keepdims=True)   # (bc_tile, 1)
        o_ref[...] = jnp.log(total * inv_n) * inv_log_r_ref[...]


def _pick_bc_tile(bc, pref):
    """Sublane tile for the B*C axis: full extent if small, else a multiple
    of 8 (evenly dividing if possible; otherwise cdiv + masked edge writes)."""
    if bc <= pref:
        return bc                                  # full extent always legal
    t = (pref // 8) * 8
    while t >= 8:
        if bc % t == 0:
            return t
        t -= 8
    return (pref // 8) * 8


def alphamex(x, alpha, *, n_tile_pref=4096, bc_tile_pref=512,
             block_budget_bytes=8 * 1024 * 1024):
    B, C, H, W = x.shape
    N = H * W
    BC = B * C

    # Natural layout: (B*C, N). Reshape is free -- no extra HBM pass.
    x2 = x.reshape(BC, N)

    # alpha math hoisted out of the kernel (tiny (BC,) vectors, done by XLA).
    a = jnp.clip(alpha.astype(jnp.float32), 0.0, 0.9999)
    log_r = jnp.log(a / (1.0 - a))                               # (C,)
    log_r_bc = jnp.tile(log_r, (B,)).reshape(BC, 1)              # row = b*C + c
    inv_log_r_bc = jnp.tile(1.0 / log_r, (B,)).reshape(BC, 1)

    # ---- tile selection (budget-capped; safe on v7x's 64 MiB VMEM) --------
    bc_tile = _pick_bc_tile(BC, bc_tile_pref)
    max_n = max(128, ((block_budget_bytes // (bc_tile * 4)) // 128) * 128)
    n_pref = max(128, (n_tile_pref // 128) * 128)

    if N % 128 == 0:
        n_tile = min(N, n_pref, max_n)
        chunked = True
    elif N <= max_n:
        n_tile = N                     # odd small N: one full-extent block
        chunked = False
    else:
        n_tile = min(n_pref, max_n)    # odd large N: 128-multiples + tail mask
        chunked = True

    grid = (pl.cdiv(BC, bc_tile), pl.cdiv(N, n_tile))
    needs_mask = (N % n_tile) != 0
    acc_shape = (bc_tile, 128) if chunked else (bc_tile, 1)

    out = pl.pallas_call(
        functools.partial(_alphamex_kernel, 1.0 / float(N), N, n_tile,
                          chunked, needs_mask),
        out_shape=jax.ShapeDtypeStruct((BC, 1), jnp.float32),
        grid=grid,
        in_specs=[
            pl.BlockSpec((bc_tile, 1), lambda j, k: (j, 0)),
            pl.BlockSpec((bc_tile, 1), lambda j, k: (j, 0)),
            pl.BlockSpec((bc_tile, n_tile), lambda j, k: (j, k)),
        ],
        out_specs=pl.BlockSpec((bc_tile, 1), lambda j, k: (j, 0)),
        scratch_shapes=[pltpu.VMEM(acc_shape, jnp.float32)],
        compiler_params=pltpu.CompilerParams(
            dimension_semantics=("parallel", "arbitrary"),
            vmem_limit_bytes=32 * 1024 * 1024,
        ),
    )(log_r_bc, inv_log_r_bc, x2)

    return out.reshape(B, C)


def alphamex_ref(x, alpha):
    B, C, H, W = x.shape
    x3 = x.reshape(B, C, H * W).astype(jnp.float32)
    a = jnp.clip(alpha.astype(jnp.float32), 0.0, 0.9999)
    r = a / (1.0 - a)                          # (C,)
    powed = jnp.power(r[None, :, None], x3)    # (B, C, N)
    mean = jnp.mean(powed, axis=2)             # (B, C)
    return jnp.log(mean) / jnp.log(r)[None, :]


if __name__ == "__main__":
    key = jax.random.PRNGKey(0)
    B, C, H, W = 2, 41, 16, 16   # C must be 41 to match the module's alpha length

    x = jax.random.normal(key, (B, C, H, W), dtype=jnp.float32)
    # Deterministic parameter init, matching nn.Parameter(0.8 x 41).
    alpha = jnp.full((C,), 0.8, dtype=jnp.float32)

    out = jax.block_until_ready(alphamex(x, alpha))
    ref = alphamex_ref(x, alpha)

    assert out.shape == (B, C)
    assert jnp.allclose(out, ref, rtol=1e-5, atol=1e-5), (
        f"max abs err {jnp.max(jnp.abs(out - ref))}")

    print("KERNEL_OK")
</pallas_src>

<mosaic_0001>
module attributes {stable_mosaic.version = 11 : i64} {
  func.func @_alphamex_kernel(%arg0: i32, %arg1: i32, %arg2: memref<82x1xf32, #tpu.memory_space<vmem>>, %arg3: memref<82x1xf32, #tpu.memory_space<vmem>>, %arg4: memref<82x256xf32, #tpu.memory_space<vmem>>, %arg5: memref<82x1xf32, #tpu.memory_space<vmem>>, %arg6: memref<82x128xf32, #tpu.memory_space<vmem>>) attributes {dimension_semantics = [#tpu.dimension_semantics<parallel>, #tpu.dimension_semantics<arbitrary>], iteration_bounds = array<i64: 1, 1>, scalar_prefetch = 0 : i64, scratch_operands = 1 : i64, tpu.core_type = #tpu.core_type<tc>, window_params = [{transform_indices = @transform_0, window_bounds = array<i64: 82, 1>}, {transform_indices = @transform_1, window_bounds = array<i64: 82, 1>}, {transform_indices = @transform_2, window_bounds = array<i64: 82, 256>}, {transform_indices = @transform_3, window_bounds = array<i64: 82, 1>}]} {
    %c0_i32 = arith.constant 0 : i32
    %0 = arith.cmpi eq, %arg1, %c0_i32 : i32
    %1 = arith.extui %0 : i1 to i32
    %c0_i32_0 = arith.constant 0 : i32
    %2 = arith.cmpi ne, %1, %c0_i32_0 : i32
    scf.if %2 {
      %cst = arith.constant 0.000000e+00 : f32
      %17 = vector.broadcast %cst : f32 to vector<82x128xf32>
      %c0_10 = arith.constant 0 : index
      %c0_11 = arith.constant 0 : index
      %18 = vector.load %arg6[%c0_10, %c0_11] : memref<82x128xf32, #tpu.memory_space<vmem>>, vector<82x128xf32>
      tpu.vector_store %arg6[%c0_10, %c0_11], %17 {strides = array<i32>} : memref<82x128xf32, #tpu.memory_space<vmem>>, vector<82x128xf32>,
    } else {
    }
    %c0 = arith.constant 0 : index
    %c0_1 = arith.constant 0 : index
    %3 = vector.load %arg2[%c0, %c0_1] : memref<82x1xf32, #tpu.memory_space<vmem>>, vector<82x1xf32>
    %c0_2 = arith.constant 0 : index
    %c0_3 = arith.constant 0 : index
    %4 = vector.load %arg4[%c0_2, %c0_3] : memref<82x256xf32, #tpu.memory_space<vmem>>, vector<82x256xf32>
    %5 = vector.broadcast %3 : vector<82x1xf32> to vector<82x256xf32>
    %6 = arith.mulf %4, %5 : vector<82x256xf32>
    %7 = math.exp %6 : vector<82x256xf32>
    %c0_4 = arith.constant 0 : index
    %c0_5 = arith.constant 0 : index
    %8 = vector.load %arg6[%c0_4, %c0_5] : memref<82x128xf32, #tpu.memory_space<vmem>>, vector<82x128xf32>
    %9 = vector.extract_strided_slice %7 {offsets = [0, 0], sizes = [82, 128], strides = [1, 1]} : vector<82x256xf32> to vector<82x128xf32>
    %10 = arith.addf %8, %9 : vector<82x128xf32>
    %11 = vector.extract_strided_slice %7 {offsets = [0, 128], sizes = [82, 128], strides = [1, 1]} : vector<82x256xf32> to vector<82x128xf32>
    %12 = arith.addf %10, %11 : vector<82x128xf32>
    %c0_6 = arith.constant 0 : index
    %c0_7 = arith.constant 0 : index
    %13 = vector.load %arg6[%c0_6, %c0_7] : memref<82x128xf32, #tpu.memory_space<vmem>>, vector<82x128xf32>
    tpu.vector_store %arg6[%c0_6, %c0_7], %12 {strides = array<i32>} : memref<82x128xf32, #tpu.memory_space<vmem>>, vector<82x128xf32>,
    %c0_i32_8 = arith.constant 0 : i32
    %14 = arith.cmpi eq, %arg1, %c0_i32_8 : i32
    %15 = arith.extui %14 : i1 to i32
    %c0_i32_9 = arith.constant 0 : i32
    %16 = arith.cmpi ne, %15, %c0_i32_9 : i32
    scf.if %16 {
      %c0_10 = arith.constant 0 : index
      %c0_11 = arith.constant 0 : index
      %17 = vector.load %arg6[%c0_10, %c0_11] : memref<82x128xf32, #tpu.memory_space<vmem>>, vector<82x128xf32>
      %cst = arith.constant dense<0.000000e+00> : vector<82xf32>
      %18 = vector.multi_reduction <add>, %17, %cst [1] : vector<82x128xf32> to vector<82xf32>
      %19 = vector.shape_cast %18 : vector<82xf32> to vector<82x1xf32>
      %cst_12 = arith.constant 3.906250e-03 : f32
      %20 = vector.broadcast %cst_12 : f32 to vector<82x1xf32>
      %21 = arith.mulf %19, %20 : vector<82x1xf32>
      %22 = math.log %21 : vector<82x1xf32>
      %c0_13 = arith.constant 0 : index
      %c0_14 = arith.constant 0 : index
      %23 = vector.load %arg3[%c0_13, %c0_14] : memref<82x1xf32, #tpu.memory_space<vmem>>, vector<82x1xf32>
      %24 = arith.mulf %22, %23 : vector<82x1xf32>
      %c0_15 = arith.constant 0 : index
      %c0_16 = arith.constant 0 : index
      %25 = vector.load %arg5[%c0_15, %c0_16] : memref<82x1xf32, #tpu.memory_space<vmem>>, vector<82x1xf32>
      tpu.vector_store %arg5[%c0_15, %c0_16], %24 {strides = array<i32>} : memref<82x1xf32, #tpu.memory_space<vmem>>, vector<82x1xf32>,
    } else {
    }
    return
  }
  func.func @transform_0(%arg0: i32, %arg1: i32) -> (i32, i32) {
    %c0_i32 = arith.constant 0 : i32
    %c0_i32_0 = arith.constant 0 : i32
    return %arg0, %c0_i32 : i32, i32
  }
  func.func @transform_1(%arg0: i32, %arg1: i32) -> (i32, i32) {
    %c0_i32 = arith.constant 0 : i32
    %c0_i32_0 = arith.constant 0 : i32
    return %arg0, %c0_i32 : i32, i32
  }
  func.func @transform_2(%arg0: i32, %arg1: i32) -> (i32, i32) {
    %c0_i32 = arith.constant 0 : i32
    return %arg0, %arg1 : i32, i32
  }
  func.func @transform_3(%arg0: i32, %arg1: i32) -> (i32, i32) {
    %c0_i32 = arith.constant 0 : i32
    %c0_i32_0 = arith.constant 0 : i32
    return %arg0, %c0_i32 : i32, i32
  }
}

</mosaic_0001>

<bundles_post_ra>
// kernel: tpu_custom_call.1
= control target key start
LH: loop header
LB: loop body
LE: loop exit
PB: predicated region body
PF: predicated region fallthrough
CT: control target
= control target key end

     0   :  { %v407_v0 = vmov 0   ;;  %v408_v3 = vmov 0.0   ;;  %vm261_vm0 = vcmask 1041408   ;;  %vm320_vm1 = vcmask 7168   ;;  %s604_s0 = inlined_call_operand.vmem [shape: f32[82,1], index: 0, kind: input, shape index: {}]   ;;  %s605_s2 = inlined_call_operand.vmem [shape: f32[82,256], index: 2, kind: input, shape index: {}]   ;;  %s606_s1 = inlined_call_operand.vmem [shape: f32[82,1], index: 1, kind: input, shape index: {}]   ;;  %s607_s3 = inlined_call_operand.vmem [shape: f32[82,1], index: 3, kind: output, shape index: {}]  }
   0x1   :  { %340 = vset.pattern.permute.xlu1 %v407_v0  ;;  %339 = vset.pattern.permute.xlu0 %v407_v0  ;;  %v39_v1 = vld [vmem:[%s604_s0 + $0x50] sm:$0x3]  ;;  %v30_v2 = vld [vmem:[%s604_s0 + $0x8] sm:$0xff]  ;;  %28 = vst [vmem:[#allocation2 + $0x50] sm:$0x3] %v408_v3  ;;  %v29_v5 = vld [vmem:[%s604_s0] sm:$0xff] }
   0x2   :  { %114 = vperm.xlu0 %339, %v39_v1   ;;  %69 = vperm.xlu1 %340, %v30_v2   ;;  %v31_v4 = vld [vmem:[%s604_s0 + $0x10] sm:$0xff]  ;;  %v33_v6 = vld [vmem:[%s604_s0 + $0x20] sm:$0xff]  ;;  %v32_v7 = vld [vmem:[%s604_s0 + $0x18] sm:$0xff]  ;;  %vm331_vm2 = vcmask 1024  }
   0x3   :  { %v35_v8 = vld [vmem:[%s604_s0 + $0x30] sm:$0xff]  ;;  %v34_v9 = vld [vmem:[%s604_s0 + $0x28] sm:$0xff]  ;;  %v37_v10 = vld [vmem:[%s604_s0 + $0x40] sm:$0xff] }
   0x4   :  { %v36_v11 = vld [vmem:[%s604_s0 + $0x38] sm:$0xff]  ;;  %v38_v12 = vld [vmem:[%s604_s0 + $0x48] sm:$0xff]  ;;  %v60_v13 = vld [vmem:[%s605_s2 + $0xa0] sm:$0x3] }
   0x5   :  { %v61_v14 = vld [vmem:[%s605_s2 + $0xa8] sm:$0x3]  ;;  %v42_v15 = vld [vmem:[%s605_s2 + $0x10] sm:$0xff]  ;;  %v43_v16 = vld [vmem:[%s605_s2 + $0x18] sm:$0xff] }
   0x6   :  { %74 = vperm.xlu1 %340, %v31_v4   ;;  %64 = vperm.xlu0 %339, %v29_v5   ;;  %v44_v23 = vld [vmem:[%s605_s2 + $0x20] sm:$0xff]  ;;  %v45_v24 = vld [vmem:[%s605_s2 + $0x28] sm:$0xff]  ;;  %v46_v39 = vld [vmem:[%s605_s2 + $0x30] sm:$0xff] }
   0x7   :  { %v40_v25 = vld [vmem:[%s605_s2] sm:$0xff]  ;;  %v41_v26 = vld [vmem:[%s605_s2 + $0x8] sm:$0xff]  ;;  %v47_v40 = vld [vmem:[%s605_s2 + $0x38] sm:$0xff] }
   0x8   :  { %v48_v36 = vld [vmem:[%s605_s2 + $0x40] sm:$0xff]  ;;  %v49_v38 = vld [vmem:[%s605_s2 + $0x48] sm:$0xff]  ;;  %v50_v53 = vld [vmem:[%s605_s2 + $0x50] sm:$0xff] }
   0x9   :  { %v52_v50 = vld [vmem:[%s605_s2 + $0x60] sm:$0xff]  ;;  %v53_v52 = vld [vmem:[%s605_s2 + $0x68] sm:$0xff]  ;;  %v51_v54 = vld [vmem:[%s605_s2 + $0x58] sm:$0xff] }
   0xa   :  { %84 = vperm.xlu1 %340, %v33_v6   ;;  %79 = vperm.xlu0 %339, %v32_v7   ;;  %v193_v61 = vld [vmem:[#allocation2 + $0x50] sm:$0x3]  ;;  %v57_v3 = vld [vmem:[%s605_s2 + $0x88] sm:$0xff]  ;;  %v54_v4 = vld [vmem:[%s605_s2 + $0x70] sm:$0xff] }
   0xb   :  { %v56_v1 = vld [vmem:[%s605_s2 + $0x80] sm:$0xff]  ;;  %v55_v5 = vld [vmem:[%s605_s2 + $0x78] sm:$0xff] }
   0xe   :  { %94 = vperm.xlu1 %340, %v35_v8   ;;  %89 = vperm.xlu0 %339, %v34_v9  }
  0x12   :  { %104 = vperm.xlu1 %340, %v37_v10   ;;  %99 = vperm.xlu0 %339, %v36_v11  }
  0x16   :  { %109 = vperm.xlu0 %339, %v38_v12  }
  0x81   :  { %v115_v17 = vpop.permute.xlu0 %114  ;;  %v70_v18 = vpop.permute.xlu1 %69 }
  0x82   :  { %v137_v19 = vmul.f32 %v115_v17, %v60_v13  ;;  %v138_v20 = vmul.f32 %v115_v17, %v61_v14  ;;  %v119_v21 = vmul.f32 %v70_v18, %v42_v15  ;;  %v120_v22 = vmul.f32 %v70_v18, %v43_v16 }
  0x84   :  { %v179_v27 = vmul.f32 1.442695, %v137_v19  ;;  %v181_v28 = vmul.f32 1.442695, %v138_v20  ;;  %v143_v29 = vmul.f32 1.442695, %v119_v21 }
  0x85   :  { %v145_v30 = vmul.f32 1.442695, %v120_v22  ;;  %v75_v31 = vpop.permute.xlu1 %74  ;;  %v65_v32 = vpop.permute.xlu0 %64  ;;  %v58_v22 = vld [vmem:[%s605_s2 + $0x90] sm:$0xff] }
  0x86   :  { %341 = vpow2.f32 %v179_v27  ;;  %v121_v33 = vmul.f32 %v75_v31, %v44_v23  ;;  %v122_v34 = vmul.f32 %v75_v31, %v45_v24  ;;  %v117_v35 = vmul.f32 %v65_v32, %v40_v25  ;;  %v59_v23 = vld [vmem:[%s605_s2 + $0x98] sm:$0xff] }
  0x87   :  { %343 = vpow2.f32 %v181_v28  ;;  %v118_v37 = vmul.f32 %v65_v32, %v41_v26 }
  0x88   :  { %345 = vpow2.f32 %v143_v29  ;;  %v147_v41 = vmul.f32 1.442695, %v121_v33  ;;  %v149_v42 = vmul.f32 1.442695, %v122_v34  ;;  %v139_v43 = vmul.f32 1.442695, %v117_v35 }
  0x89   :  { %347 = vpow2.f32 %v145_v30  ;;  %v141_v44 = vmul.f32 1.442695, %v118_v37  ;;  %v85_v45 = vpop.permute.xlu1 %84  ;;  %v80_v46 = vpop.permute.xlu0 %79 }
  0x8a   :  { %349 = vpow2.f32 %v147_v41  ;;  %v125_v47 = vmul.f32 %v85_v45, %v48_v36  ;;  %v126_v48 = vmul.f32 %v85_v45, %v49_v38  ;;  %v123_v49 = vmul.f32 %v80_v46, %v46_v39 }
  0x8b   :  { %351 = vpow2.f32 %v149_v42  ;;  %v124_v51 = vmul.f32 %v80_v46, %v47_v40 }
  0x8c   :  { %353 = vpow2.f32 %v139_v43  ;;  %v155_v55 = vmul.f32 1.442695, %v125_v47  ;;  %v157_v56 = vmul.f32 1.442695, %v126_v48  ;;  %v151_v57 = vmul.f32 1.442695, %v123_v49 }
  0x8d   :  { %355 = vpow2.f32 %v141_v44  ;;  %v153_v58 = vmul.f32 1.442695, %v124_v51  ;;  %v95_v59 = vpop.permute.xlu1 %94  ;;  %v90_v60 = vpop.permute.xlu0 %89 }
  0x8e   :  { %357 = vpow2.f32 %v155_v55  ;;  %v129_v62 = vmul.f32 %v95_v59, %v52_v50  ;;  %v130_v63 = vmul.f32 %v95_v59, %v53_v52  ;;  %v127_v0 = vmul.f32 %v90_v60, %v50_v53 }
  0x8f   :  { %359 = vpow2.f32 %v157_v56  ;;  %v128_v2 = vmul.f32 %v90_v60, %v51_v54 }
  0x90   :  { %v342_v6 = vpop.eup %341  ;;  %361 = vpow2.f32 %v151_v57  ;;  %v163_v7 = vmul.f32 1.442695, %v129_v62  ;;  %v165_v8 = vmul.f32 1.442695, %v130_v63  ;;  %v159_v9 = vmul.f32 1.442695, %v127_v0 }
  0x91   :  { %v344_v10 = vpop.eup %343  ;;  %v204_v11 = vadd.f32 %v342_v6, %v193_v61  ;;  %363 = vpow2.f32 %v153_v58  ;;  %v161_v12 = vmul.f32 1.442695, %v128_v2  ;;  %v105_v13 = vpop.permute.xlu1 %104 }
  0x92   :  { %v100_v14 = vpop.permute.xlu0 %99  ;;  %v346_v15 = vpop.eup %345  ;;  %365 = vpow2.f32 %v163_v7  ;;  %v133_v16 = vmul.f32 %v105_v13, %v56_v1  ;;  %v134_v17 = vmul.f32 %v105_v13, %v57_v3 }
  0x93   :  { %v131_v18 = vmul.f32 %v100_v14, %v54_v4  ;;  %v348_v19 = vpop.eup %347  ;;  %v215_v20 = vadd.f32 %v344_v10, %v204_v11  ;;  %367 = vpow2.f32 %v165_v8  ;;  %v132_v21 = vmul.f32 %v100_v14, %v55_v5 }
  0x94   :  { %v350_v24 = vpop.eup %349  ;;  %369 = vpow2.f32 %v159_v9  ;;  %v171_v25 = vmul.f32 1.442695, %v133_v16  ;;  %v173_v26 = vmul.f32 1.442695, %v134_v17  ;;  %v206_v29 = vadd.f32 %v348_v19, %v346_v15 }
  0x95   :  { %v167_v27 = vmul.f32 1.442695, %v131_v18  ;;  %v352_v28 = vpop.eup %351  ;;  %226 = vst [vmem:[#allocation2 + $0x50] sm:$0x3] %v215_v20  ;;  %371 = vpow2.f32 %v161_v12  ;;  %v169_v30 = vmul.f32 1.442695, %v132_v21 }
  0x96   :  { %v110_v31 = vpop.permute.xlu0 %109  ;;  %v354_v32 = vpop.eup %353  ;;  %373 = vpow2.f32 %v171_v25  ;;  %v207_v36 = vadd.f32 %v352_v28, %v350_v24  ;;  %243 = vadd.xlane.f32.xlu0 %v206_v29  ;;  %v299_v12 = vld [vmem:[%s606_s1 + $0x8] sm:$0xff]  ;;  %v298_v20 = vld [vmem:[%s606_s1] sm:$0xff]  ;;  %v300_v25 = vld [vmem:[%s606_s1 + $0x10] sm:$0xff] }
  0x97   :  { %v135_v33 = vmul.f32 %v110_v31, %v58_v22  ;;  %v136_v34 = vmul.f32 %v110_v31, %v59_v23  ;;  %v356_v35 = vpop.eup %355  ;;  %375 = vpow2.f32 %v173_v26 }
  0x98   :  { %v358_v37 = vpop.eup %357  ;;  %377 = vpow2.f32 %v167_v27  ;;  %v205_v41 = vadd.f32 %v356_v35, %v354_v32  ;;  %v301_v32 = vld [vmem:[%s606_s1 + $0x18] sm:$0xff] }
  0x99   :  { %v175_v38 = vmul.f32 1.442695, %v135_v33  ;;  %v177_v39 = vmul.f32 1.442695, %v136_v34  ;;  %v360_v40 = vpop.eup %359  ;;  %379 = vpow2.f32 %v169_v30 }
  0x9a   :  { %v362_v42 = vpop.eup %361  ;;  %v209_v44 = vadd.f32 %v360_v40, %v358_v37  ;;  %245 = vadd.xlane.f32.xlu0 %v207_v36  ;;  %241 = vadd.xlane.f32.xlu1 %v205_v41  ;;  %v302_v37 = vld [vmem:[%s606_s1 + $0x20] sm:$0xff] }
  0x9b   :  { %381 = vpow2.f32 %v175_v38  ;;  %v364_v43 = vpop.eup %363 }
  0x9c   :  { %v366_v45 = vpop.eup %365  ;;  %383 = vpow2.f32 %v177_v39  ;;  %v208_v47 = vadd.f32 %v364_v43, %v362_v42  ;;  %v240_v61 = vld [vmem:[#allocation2 + $0x50] sm:$0x3]  ;;  %v303_v42 = vld [vmem:[%s606_s1 + $0x28] sm:$0xff] }
  0x9d   :  { %v368_v46 = vpop.eup %367  ;;  %v262_v62 = vsel %vm261_vm0, %v240_v61, 0.0  ;;  %v308_v61 = vld [vmem:[%s606_s1 + $0x50] sm:$0x3] }
  0x9e   :  { %v370_v48 = vpop.eup %369  ;;  %v211_v50 = vadd.f32 %v368_v46, %v366_v45  ;;  %249 = vadd.xlane.f32.xlu0 %v209_v44  ;;  %247 = vadd.xlane.f32.xlu1 %v208_v47  ;;  %v304_v45 = vld [vmem:[%s606_s1 + $0x30] sm:$0xff] }
  0x9f   :  { %v372_v49 = vpop.eup %371 }
  0xa0   :  { %v374_v51 = vpop.eup %373  ;;  %v210_v53 = vadd.f32 %v372_v49, %v370_v48 }
  0xa1   :  { %v376_v52 = vpop.eup %375 }
  0xa2   :  { %v378_v54 = vpop.eup %377  ;;  %v213_v56 = vadd.f32 %v376_v52, %v374_v51  ;;  %253 = vadd.xlane.f32.xlu0 %v211_v50  ;;  %251 = vadd.xlane.f32.xlu1 %v210_v53  ;;  %v305_v50 = vld [vmem:[%s606_s1 + $0x38] sm:$0xff]  ;;  %v306_v53 = vld [vmem:[%s606_s1 + $0x40] sm:$0xff] }
  0xa3   :  { %v380_v55 = vpop.eup %379 }
  0xa4   :  { %v212_v58 = vadd.f32 %v380_v55, %v378_v54 }
  0xa5   :  { %v382_v57 = vpop.eup %381 }
  0xa6   :  { %v384_v59 = vpop.eup %383  ;;  %257 = vadd.xlane.f32.xlu0 %v213_v56  ;;  %255 = vadd.xlane.f32.xlu1 %v212_v58  ;;  %v307_v58 = vld [vmem:[%s606_s1 + $0x48] sm:$0xff] }
  0xa7   :  { %v214_v60 = vadd.f32 %v384_v59, %v382_v57 }
  0xaa   :  { %263 = vadd.xlane.f32.xlu0 %v262_v62  ;;  %259 = vadd.xlane.f32.xlu1 %v214_v60 }
 0x123   :  { %v244_v63 = vpop.xlane.xlu0 %243 }
 0x124   :  { %v266_v0 = vmul.f32 0.00390625, %v244_v63 }
 0x126   :  { %385 = vlog2.f32 %v266_v0 }
 0x127   :  { %v242_v1 = vpop.xlane.xlu1 %241  ;;  %v246_v2 = vpop.xlane.xlu0 %245 }
 0x128   :  { %v265_v3 = vmul.f32 0.00390625, %v242_v1  ;;  %v267_v4 = vmul.f32 0.00390625, %v246_v2 }
 0x12a   :  { %387 = vlog2.f32 %v265_v3 }
 0x12b   :  { %389 = vlog2.f32 %v267_v4  ;;  %v248_v5 = vpop.xlane.xlu1 %247  ;;  %v250_v6 = vpop.xlane.xlu0 %249 }
 0x12c   :  { %v268_v7 = vmul.f32 0.00390625, %v248_v5  ;;  %v269_v8 = vmul.f32 0.00390625, %v250_v6 }
 0x12e   :  { %391 = vlog2.f32 %v268_v7 }
 0x12f   :  { %393 = vlog2.f32 %v269_v8  ;;  %v252_v9 = vpop.xlane.xlu1 %251  ;;  %v254_v10 = vpop.xlane.xlu0 %253 }
 0x130   :  { %v386_v11 = vpop.eup %385  ;;  %v270_v13 = vmul.f32 0.00390625, %v252_v9  ;;  %v271_v14 = vmul.f32 0.00390625, %v254_v10 }
 0x131   :  { %v279_v15 = vmul.f32 0.6931472, %v386_v11 }
 0x132   :  { %395 = vlog2.f32 %v270_v13 }
 0x133   :  { %v310_v16 = vmul.f32 %v299_v12, %v279_v15  ;;  %397 = vlog2.f32 %v271_v14  ;;  %v256_v17 = vpop.xlane.xlu1 %255  ;;  %v258_v18 = vpop.xlane.xlu0 %257 }
 0x134   :  { %v388_v19 = vpop.eup %387  ;;  %v272_v21 = vmul.f32 0.00390625, %v256_v17  ;;  %v273_v22 = vmul.f32 0.00390625, %v258_v18 }
 0x135   :  { %v390_v23 = vpop.eup %389  ;;  %322 = vst.msk [vmem:[%s607_s3 + $0x8] sm:$0xff] %vm320_vm1, %v310_v16  ;;  %v277_v24 = vmul.f32 0.6931472, %v388_v19 }
 0x136   :  { %v281_v26 = vmul.f32 0.6931472, %v390_v23  ;;  %399 = vlog2.f32 %v272_v21 }
 0x137   :  { %v309_v27 = vmul.f32 %v298_v20, %v277_v24  ;;  %401 = vlog2.f32 %v273_v22  ;;  %v260_v28 = vpop.xlane.xlu1 %259  ;;  %v264_v29 = vpop.xlane.xlu0 %263 }
 0x138   :  { %v392_v30 = vpop.eup %391  ;;  %v311_v31 = vmul.f32 %v300_v25, %v281_v26  ;;  %v274_v33 = vmul.f32 0.00390625, %v260_v28  ;;  %v275_v34 = vmul.f32 0.00390625, %v264_v29 }
 0x139   :  { %v394_v35 = vpop.eup %393  ;;  %321 = vst.msk [vmem:[%s607_s3] sm:$0xff] %vm320_vm1, %v309_v27  ;;  %v283_v36 = vmul.f32 0.6931472, %v392_v30 }
 0x13a   :  { %323 = vst.msk [vmem:[%s607_s3 + $0x10] sm:$0xff] %vm320_vm1, %v311_v31  ;;  %v285_v38 = vmul.f32 0.6931472, %v394_v35  ;;  %403 = vlog2.f32 %v274_v33 }
 0x13b   :  { %v312_v39 = vmul.f32 %v301_v32, %v283_v36  ;;  %405 = vlog2.f32 %v275_v34 }
 0x13c   :  { %v396_v40 = vpop.eup %395  ;;  %v313_v41 = vmul.f32 %v302_v37, %v285_v38 }
 0x13d   :  { %v398_v43 = vpop.eup %397  ;;  %324 = vst.msk [vmem:[%s607_s3 + $0x18] sm:$0xff] %vm320_vm1, %v312_v39  ;;  %v287_v44 = vmul.f32 0.6931472, %v396_v40 }
 0x13e   :  { %325 = vst.msk [vmem:[%s607_s3 + $0x20] sm:$0xff] %vm320_vm1, %v313_v41  ;;  %v289_v46 = vmul.f32 0.6931472, %v398_v43 }
 0x13f   :  { %v314_v47 = vmul.f32 %v303_v42, %v287_v44 }
 0x140   :  { %v400_v48 = vpop.eup %399  ;;  %v315_v49 = vmul.f32 %v304_v45, %v289_v46 }
 0x141   :  { %v402_v51 = vpop.eup %401  ;;  %326 = vst.msk [vmem:[%s607_s3 + $0x28] sm:$0xff] %vm320_vm1, %v314_v47  ;;  %v291_v52 = vmul.f32 0.6931472, %v400_v48 }
 0x142   :  { %327 = vst.msk [vmem:[%s607_s3 + $0x30] sm:$0xff] %vm320_vm1, %v315_v49  ;;  %v293_v54 = vmul.f32 0.6931472, %v402_v51 }
 0x143   :  { %v316_v55 = vmul.f32 %v305_v50, %v291_v52 }
 0x144   :  { %v404_v56 = vpop.eup %403  ;;  %v317_v57 = vmul.f32 %v306_v53, %v293_v54 }
 0x145   :  { %v406_v59 = vpop.eup %405  ;;  %328 = vst.msk [vmem:[%s607_s3 + $0x38] sm:$0xff] %vm320_vm1, %v316_v55  ;;  %v295_v60 = vmul.f32 0.6931472, %v404_v56 }
 0x146   :  { %329 = vst.msk [vmem:[%s607_s3 + $0x40] sm:$0xff] %vm320_vm1, %v317_v57  ;;  %v297_v62 = vmul.f32 0.6931472, %v406_v59 }
 0x147   :  { %v318_v63 = vmul.f32 %v307_v58, %v295_v60 }
 0x148   :  { %v319_v0 = vmul.f32 %v308_v61, %v297_v62 }
 0x149   :  { %330 = vst.msk [vmem:[%s607_s3 + $0x48] sm:$0xff] %vm320_vm1, %v318_v63 }
 0x14a   :  { %332 = vst.msk [vmem:[%s607_s3 + $0x50] sm:$0x3] %vm331_vm2, %v319_v0 }

</bundles_post_ra>
